<compile_context>
chip_gen: v7x
topology: tpu7x:2x2x1
jax: 0.10.0
libtpu: 0.0.40
codegen_flags: <defaults>
</compile_context>

<pallas_src>
import functools

import jax
import jax.numpy as jnp
from jax import lax
from jax.experimental import pallas as pl
from jax.experimental.pallas import tpu as pltpu

# User-mask fill value: exp(_MASK_VALUE - finite_row_max) underflows to exactly
# 0, so partially-masked rows match the reference bit-for-bit (up to dtype).
_MASK_VALUE = -1e30


# ----------------------------------------------------------------------------
# Small helpers
# ----------------------------------------------------------------------------
def _round_up(x, m):
    return ((x + m - 1) // m) * m


def _cdiv(a, b):
    return -(-a // b)


def _pad_axis(x, target, axis):
    if x.shape[axis] == target:
        return x
    widths = [(0, 0)] * x.ndim
    widths[axis] = (0, target - x.shape[axis])
    return jnp.pad(x, widths)


def _largest_chunk(lk_pad, target):
    """Largest multiple of 128 that divides lk_pad and is <= max(target, 128)."""
    n = lk_pad // 128
    target = max(int(target), 128)
    best = 1
    for c in range(1, n + 1):
        if n % c == 0 and c * 128 <= target:
            best = c
    return best * 128


def _hw_config():
    """Generation-aware tile sizes / VMEM budget / pipeline depths."""
    kind = ""
    try:
        kind = jax.devices()[0].device_kind.lower()
    except Exception:
        pass
    if "v7" in kind or "tpu7" in kind:
        # 2 TensorCores, 64 MiB VMEM/TC, 256x256 MXU.
        return dict(name="v7x", tile_q=256, tile_k=256,
                    vmem_limit=48 * 1024 * 1024,
                    attn_kv_single_buffer=True, flash_kv_buffers=2,
                    two_cores=True)
    if "v6" in kind or "trillium" in kind:
        # 128 MiB VMEM, 256x256 MXU: big tiles + deeper flash K/V pipeline.
        return dict(name="v6e", tile_q=256, tile_k=256,
                    vmem_limit=64 * 1024 * 1024,
                    attn_kv_single_buffer=False, flash_kv_buffers=3,
                    two_cores=False)
    if "v5e" in kind or "v5 lite" in kind or "v5lite" in kind:
        # 128x128 MXU: 128 tiles already fill it; bf16 feed is the main win.
        return dict(name="v5e", tile_q=128, tile_k=128,
                    vmem_limit=64 * 1024 * 1024,
                    attn_kv_single_buffer=False, flash_kv_buffers=2,
                    two_cores=False)
    # Unknown: conservative settings identical to the previously validated run.
    return dict(name="unknown", tile_q=128, tile_k=128,
                vmem_limit=32 * 1024 * 1024,
                attn_kv_single_buffer=False, flash_kv_buffers=2,
                two_cores=False)


def _spec(block_shape, index_map, buffers=None):
    if buffers is None or buffers == 2:
        return pl.BlockSpec(block_shape, index_map)
    return pl.BlockSpec(block_shape, index_map, pipeline_mode=pl.Buffered(buffers))


# ----------------------------------------------------------------------------
# Kernel 1: returns (out, attn).  Grid = (B, Lq_pad//TQ); K/V span full Lk_pad.
# Scores are processed in Lk chunks (two-pass online softmax) so the f32
# intermediates stay bounded even for long Lk.
# ----------------------------------------------------------------------------
def _sdpa_attn_kernel(*refs, inv_temperature, has_mask, lk_valid, chunk):
    if has_mask:
        q_ref, k_ref, v_ref, mask_ref, out_ref, attn_ref = refs
    else:
        q_ref, k_ref, v_ref, out_ref, attn_ref = refs
        mask_ref = None

    tq, _ = q_ref.shape
    lk_pad, dv = v_ref.shape
    n_chunks = lk_pad // chunk

    # Fold 1/temperature into Q: O(TQ*D) multiply instead of O(TQ*Lk).
    q = q_ref[...] * inv_temperature                      # (TQ, D), compute dtype

    def chunk_scores(off):
        kc = k_ref[off:off + chunk, :]                    # (C, D) static slice
        s = lax.dot_general(q, kc, (((1,), (1,)), ((), ())),
                            preferred_element_type=jnp.float32)   # (TQ, C) f32
        if has_mask:
            s = jnp.where(mask_ref[:, off:off + chunk] != 0, _MASK_VALUE, s)
        if lk_valid is not None:                          # padded key columns
            col = off + lax.broadcasted_iota(jnp.int32, s.shape, 1)
            s = jnp.where(col >= lk_valid, -jnp.inf, s)
        return s

    if n_chunks == 1:
        s = chunk_scores(0)
        row_max = jnp.max(s, axis=-1, keepdims=True)
        e = jnp.exp(s - row_max)
        inv_denom = pl.reciprocal(jnp.sum(e, axis=-1, keepdims=True), approx=True)
        p = e * inv_denom
        attn_ref[...] = p.astype(attn_ref.dtype)
        out_ref[...] = jnp.dot(p.astype(v_ref.dtype), v_ref[...],
                               preferred_element_type=jnp.float32
                               ).astype(out_ref.dtype)
        return

    # Pass 1: online row max / row sum over Lk chunks (no (TQ, Lk) residency).
    m = jnp.full((tq, 1), _MASK_VALUE, jnp.float32)
    l = jnp.zeros((tq, 1), jnp.float32)
    for ci in range(n_chunks):
        s = chunk_scores(ci * chunk)
        m_new = jnp.maximum(m, jnp.max(s, axis=-1, keepdims=True))
        l = jnp.exp(m - m_new) * l + jnp.sum(jnp.exp(s - m_new), axis=-1,
                                             keepdims=True)
        m = m_new
    inv_l = pl.reciprocal(l, approx=True)

    # Pass 2: recompute scores per chunk, write normalized probabilities and
    # accumulate the PV product (f32 accumulator, bf16 MXU operands).
    acc = jnp.zeros((tq, dv), jnp.float32)
    for ci in range(n_chunks):
        off = ci * chunk
        s = chunk_scores(off)
        p = jnp.exp(s - m) * inv_l
        attn_ref[:, off:off + chunk] = p.astype(attn_ref.dtype)
        acc = acc + jnp.dot(p.astype(v_ref.dtype), v_ref[off:off + chunk, :],
                            preferred_element_type=jnp.float32)
    out_ref[...] = acc.astype(out_ref.dtype)


# ----------------------------------------------------------------------------
# Kernel 2: out only.  Grid = (B, Lq_pad//TQ, Lk_pad//TK); flash-style online
# softmax with m/l/acc carried in VMEM scratch across the (arbitrary) Lk axis.
# ----------------------------------------------------------------------------
def _sdpa_flash_kernel(*refs, inv_temperature, has_mask, lk_valid):
    if has_mask:
        q_ref, k_ref, v_ref, mask_ref, out_ref, m_scr, l_scr, acc_scr = refs
    else:
        q_ref, k_ref, v_ref, out_ref, m_scr, l_scr, acc_scr = refs
        mask_ref = None

    ki = pl.program_id(2)
    tk = k_ref.shape[0]

    @pl.when(ki == 0)
    def _init():
        m_scr[...] = jnp.full_like(m_scr, _MASK_VALUE)
        l_scr[...] = jnp.zeros_like(l_scr)
        acc_scr[...] = jnp.zeros_like(acc_scr)

    q = q_ref[...] * inv_temperature                      # (TQ, D)
    k = k_ref[...]                                        # (TK, D)
    v = v_ref[...]                                        # (TK, Dv)

    s = lax.dot_general(q, k, (((1,), (1,)), ((), ())),
                        preferred_element_type=jnp.float32)   # (TQ, TK) f32
    if has_mask:
        s = jnp.where(mask_ref[...] != 0, _MASK_VALUE, s)
    if lk_valid is not None:                              # padded key columns
        col = ki * tk + lax.broadcasted_iota(jnp.int32, s.shape, 1)
        s = jnp.where(col >= lk_valid, -jnp.inf, s)

    # Online softmax update.
    m_prev = m_scr[...]
    m_new = jnp.maximum(m_prev, jnp.max(s, axis=-1, keepdims=True))
    alpha = jnp.exp(m_prev - m_new)
    p = jnp.exp(s - m_new)
    l_scr[...] = alpha * l_scr[...] + jnp.sum(p, axis=-1, keepdims=True)
    acc_scr[...] = alpha * acc_scr[...] + jnp.dot(
        p.astype(v.dtype), v, preferred_element_type=jnp.float32)
    m_scr[...] = m_new

    @pl.when(ki == pl.num_programs(2) - 1)
    def _finalize():
        out_ref[...] = (acc_scr[...] *
                        pl.reciprocal(l_scr[...], approx=True)
                        ).astype(out_ref.dtype)


# ----------------------------------------------------------------------------
# Wrapper
# ----------------------------------------------------------------------------
def scaled_dot_product_attention(q, k, v, temperature, mask=None,
                                 return_attn=True, *,
                                 mxu_dtype=jnp.bfloat16,
                                 tile_q=None, tile_k=None,
                                 attn_lk_chunk=512):
    """Pallas implementation of ScaledDotProductAttention.forward.

    q: (B, Lq, D), k: (B, Lk, D), v: (B, Lk, Dv), mask: optional bool (B, Lq, Lk).
    Returns (output, attn) when return_attn=True (module semantics), otherwise
    just output via the Lk-tiled flash path.  Outputs keep q's dtype; matmul
    operands are fed to the MXU in `mxu_dtype` (bf16 by default) with f32
    accumulation — pass mxu_dtype=jnp.float32 for bit-faithful f32 math.
    """
    B, Lq, D = q.shape
    Bk, Lk, Dk = k.shape
    Bv, Lkv, Dv = v.shape
    assert (Bk, Dk) == (B, D) and (Bv, Lkv) == (B, Lk)
    if mask is not None:
        assert mask.shape == (B, Lq, Lk)

    cfg = _hw_config()
    out_dtype = q.dtype
    has_mask = mask is not None
    inv_temperature = 1.0 / float(temperature)

    # bf16 MXU feed (f32 accumulation inside the kernels).
    q = q.astype(mxu_dtype)
    k = k.astype(mxu_dtype)
    v = v.astype(mxu_dtype)

    # ---- Q tiling (shared by both paths) ------------------------------------
    tile_q = tile_q or cfg["tile_q"]
    tile_k = tile_k or cfg["tile_k"]
    tq = min(tile_q, _round_up(Lq, 8))
    # Keep >=2 parallel (b, qi) blocks so both v7x TensorCores stay busy.
    if cfg["two_cores"] and tq > 128 and B * _cdiv(Lq, tq) < 2:
        tq = max(128, _round_up(_cdiv(Lq, 2), 8))
    Lq_pad = _round_up(Lq, tq)

    q = _pad_axis(q, Lq_pad, 1)
    mask_i8 = None
    if has_mask:
        mask_i8 = _pad_axis(mask.astype(jnp.int8), Lq_pad, 1)  # 1 byte/elem

    # ========================================================================
    # Path A: returns (out, attn).  Lk padded to a lane-dense multiple of 128.
    # ========================================================================
    if return_attn:
        Lk_pad = _round_up(Lk, 128)
        chunk = _largest_chunk(Lk_pad, attn_lk_chunk)
        lk_valid = Lk if Lk_pad != Lk else None

        k_p = _pad_axis(k, Lk_pad, 1)
        v_p = _pad_axis(v, Lk_pad, 1)
        inputs = [q, k_p, v_p]
        if has_mask:
            inputs.append(_pad_axis(mask_i8, Lk_pad, 2))

        # K/V only change with b -> single-buffer them on v7x when large.
        kv_bytes = Lk_pad * (D + Dv) * k_p.dtype.itemsize
        kv_buf = 1 if (cfg["attn_kv_single_buffer"]
                       and kv_bytes > 4 * 1024 * 1024) else None

        in_specs = [
            pl.BlockSpec((None, tq, D), lambda b, qi: (b, qi, 0)),
            _spec((None, Lk_pad, D), lambda b, qi: (b, 0, 0), kv_buf),
            _spec((None, Lk_pad, Dv), lambda b, qi: (b, 0, 0), kv_buf),
        ]
        if has_mask:
            in_specs.append(
                pl.BlockSpec((None, tq, Lk_pad), lambda b, qi: (b, qi, 0)))
        out_specs = [
            pl.BlockSpec((None, tq, Dv), lambda b, qi: (b, qi, 0)),
            pl.BlockSpec((None, tq, Lk_pad), lambda b, qi: (b, qi, 0)),
        ]
        out_shape = [
            jax.ShapeDtypeStruct((B, Lq_pad, Dv), out_dtype),
            jax.ShapeDtypeStruct((B, Lq_pad, Lk_pad), out_dtype),
        ]
        kernel = functools.partial(_sdpa_attn_kernel,
                                   inv_temperature=inv_temperature,
                                   has_mask=has_mask,
                                   lk_valid=lk_valid,
                                   chunk=chunk)
        out, attn = pl.pallas_call(
            kernel,
            grid=(B, Lq_pad // tq),
            in_specs=in_specs,
            out_specs=out_specs,
            out_shape=out_shape,
            compiler_params=pltpu.CompilerParams(
                dimension_semantics=("parallel", "parallel"),
                vmem_limit_bytes=cfg["vmem_limit"]),
        )(*inputs)
        return out[:, :Lq, :], attn[:, :Lq, :Lk]

    # ========================================================================
    # Path B: out only.  Flash / online-softmax, Lk tiled in the grid.
    # ========================================================================
    tk = min(tile_k, _round_up(Lk, 128))
    Lk_pad = _round_up(Lk, tk)
    lk_valid = Lk if Lk_pad != Lk else None

    k_p = _pad_axis(k, Lk_pad, 1)
    v_p = _pad_axis(v, Lk_pad, 1)
    inputs = [q, k_p, v_p]
    if has_mask:
        inputs.append(_pad_axis(mask_i8, Lk_pad, 2))

    n_k_tiles = Lk_pad // tk
    # Deeper K/V/mask pipeline on 128 MiB parts once there are enough K tiles.
    kv_buf = cfg["flash_kv_buffers"] if (cfg["flash_kv_buffers"] != 2
                                         and n_k_tiles >= 4) else None

    grid = (B, Lq_pad // tq, n_k_tiles)
    in_specs = [
        pl.BlockSpec((None, tq, D), lambda b, qi, ki: (b, qi, 0)),
        _spec((None, tk, D), lambda b, qi, ki: (b, ki, 0), kv_buf),
        _spec((None, tk, Dv), lambda b, qi, ki: (b, ki, 0), kv_buf),
    ]
    if has_mask:
        in_specs.append(
            _spec((None, tq, tk), lambda b, qi, ki: (b, qi, ki), kv_buf))
    out_specs = [pl.BlockSpec((None, tq, Dv), lambda b, qi, ki: (b, qi, 0))]
    out_shape = [jax.ShapeDtypeStruct((B, Lq_pad, Dv), out_dtype)]
    scratch_shapes = [
        pltpu.VMEM((tq, 1), jnp.float32),    # running row max
        pltpu.VMEM((tq, 1), jnp.float32),    # running row sum
        pltpu.VMEM((tq, Dv), jnp.float32),   # output accumulator
    ]
    kernel = functools.partial(_sdpa_flash_kernel,
                               inv_temperature=inv_temperature,
                               has_mask=has_mask,
                               lk_valid=lk_valid)
    (out,) = pl.pallas_call(
        kernel,
        grid=grid,
        in_specs=in_specs,
        out_specs=out_specs,
        out_shape=out_shape,
        scratch_shapes=scratch_shapes,
        compiler_params=pltpu.CompilerParams(
            dimension_semantics=("parallel", "parallel", "arbitrary"),
            vmem_limit_bytes=cfg["vmem_limit"]),
    )(*inputs)
    return out[:, :Lq, :]


# ----------------------------------------------------------------------------
# Reference + test
# ----------------------------------------------------------------------------
def _reference(q, k, v, temperature, mask=None, compute_dtype=jnp.bfloat16):
    qc = q.astype(compute_dtype).astype(jnp.float32)
    kc = k.astype(compute_dtype).astype(jnp.float32)
    vc = v.astype(compute_dtype).astype(jnp.float32)
    attn = jnp.einsum("bqd,bkd->bqk", qc, kc) / temperature
    if mask is not None:
        attn = jnp.where(mask, -jnp.inf, attn)
    attn = jax.nn.softmax(attn, axis=2)
    out = jnp.einsum("bqk,bkd->bqd", attn, vc)
    return out.astype(q.dtype), attn.astype(q.dtype)


def _check(name, got, want, atol, rtol):
    g = got.astype(jnp.float32)
    w = want.astype(jnp.float32)
    err = float(jnp.max(jnp.abs(g - w)))
    assert jnp.allclose(g, w, atol=atol, rtol=rtol), f"{name}: max abs err {err}"


if __name__ == "__main__":
    key = jax.random.PRNGKey(0)
    kq, kk, kv, km, kq2, kk2, kv2, km2 = jax.random.split(key, 8)

    # ---- Small shapes matching the module's typical usage -------------------
    B, Lq, Lk, D, Dv = 2, 8, 8, 32, 32
    temperature = float(D) ** 0.5

    q = jax.random.normal(kq, (B, Lq, D), dtype=jnp.float32)
    k = jax.random.normal(kk, (B, Lk, D), dtype=jnp.float32)
    v = jax.random.normal(kv, (B, Lk, Dv), dtype=jnp.float32)
    mask = jax.random.bernoulli(km, p=0.2, shape=(B, Lq, Lk))
    mask = mask.at[:, :, 0].set(False)   # never a fully-masked row

    # f32 MXU mode: tight check of the kernel logic (padding, masking, softmax).
    o_e, a_e = scaled_dot_product_attention(q, k, v, temperature, mask=mask,
                                            mxu_dtype=jnp.float32)
    o_ef = scaled_dot_product_attention(q, k, v, temperature, mask=mask,
                                        return_attn=False,
                                        mxu_dtype=jnp.float32)
    r_o32, r_a32 = _reference(q, k, v, temperature, mask=mask,
                              compute_dtype=jnp.float32)
    jax.block_until_ready((o_e, a_e, o_ef))
    _check("f32 out", o_e, r_o32, 5e-3, 5e-3)
    _check("f32 attn", a_e, r_a32, 5e-3, 5e-3)
    _check("f32 flash out", o_ef, r_o32, 5e-3, 5e-3)

    # Default bf16 MXU feed (compare against a bf16-cast reference).
    out0, attn0 = scaled_dot_product_attention(q, k, v, temperature, mask=None)
    out1, attn1 = scaled_dot_product_attention(q, k, v, temperature, mask=mask)
    out2 = scaled_dot_product_attention(q, k, v, temperature, mask=mask,
                                        return_attn=False)
    jax.block_until_ready((out0, attn0, out1, attn1, out2))
    r_o0, r_a0 = _reference(q, k, v, temperature, mask=None)
    r_o1, r_a1 = _reference(q, k, v, temperature, mask=mask)
    _check("bf16 out (no mask)", out0, r_o0, 5e-2, 5e-2)
    _check("bf16 attn (no mask)", attn0, r_a0, 5e-2, 5e-2)
    _check("bf16 out (mask)", out1, r_o1, 5e-2, 5e-2)
    _check("bf16 attn (mask)", attn1, r_a1, 5e-2, 5e-2)
    _check("bf16 flash out", out2, r_o1, 5e-2, 5e-2)

    # ---- Larger shapes: Lq tiling, Lk padding, chunked softmax, flash path ---
    B2, Lq2, Lk2, D2, Dv2 = 2, 256, 384, 64, 64
    t2 = float(D2) ** 0.5
    q2 = jax.random.normal(kq2, (B2, Lq2, D2), dtype=jnp.float32)
    k2 = jax.random.normal(kk2, (B2, Lk2, D2), dtype=jnp.float32)
    v2 = jax.random.normal(kv2, (B2, Lk2, Dv2), dtype=jnp.float32)
    mask2 = jax.random.bernoulli(km2, p=0.15, shape=(B2, Lq2, Lk2))
    mask2 = mask2.at[:, :, 0].set(False)

    o_t, a_t = scaled_dot_product_attention(q2, k2, v2, t2, mask=mask2)
    o_c, a_c = scaled_dot_product_attention(q2, k2, v2, t2, mask=mask2,
                                            attn_lk_chunk=128)  # force chunking
    o_f = scaled_dot_product_attention(q2, k2, v2, t2, mask=mask2,
                                       return_attn=False)
    jax.block_until_ready((o_t, a_t, o_c, a_c, o_f))
    r_o2, r_a2 = _reference(q2, k2, v2, t2, mask=mask2)
    _check("large out", o_t, r_o2, 5e-2, 5e-2)
    _check("large attn", a_t, r_a2, 5e-2, 5e-2)
    _check("large out (chunked)", o_c, r_o2, 5e-2, 5e-2)
    _check("large attn (chunked)", a_c, r_a2, 5e-2, 5e-2)
    _check("large flash out", o_f, r_o2, 5e-2, 5e-2)

    print("KERNEL_OK")
</pallas_src>

<mosaic_0001>
module attributes {stable_mosaic.version = 11 : i64} {
  func.func @_sdpa_attn_kernel(%arg0: i32, %arg1: i32, %arg2: memref<1x8x32xf32, #tpu.memory_space<vmem>>, %arg3: memref<1x128x32xf32, #tpu.memory_space<vmem>>, %arg4: memref<1x128x32xf32, #tpu.memory_space<vmem>>, %arg5: memref<1x8x128xi8, #tpu.memory_space<vmem>>, %arg6: memref<1x8x32xf32, #tpu.memory_space<vmem>>, %arg7: memref<1x8x128xf32, #tpu.memory_space<vmem>>) attributes {dimension_semantics = [#tpu.dimension_semantics<parallel>, #tpu.dimension_semantics<parallel>], iteration_bounds = array<i64: 2, 1>, scalar_prefetch = 0 : i64, scratch_operands = 0 : i64, tpu.core_type = #tpu.core_type<tc>, window_params = [{transform_indices = @transform_0, window_bounds = array<i64: 1, 8, 32>}, {transform_indices = @transform_1, window_bounds = array<i64: 1, 128, 32>}, {transform_indices = @transform_2, window_bounds = array<i64: 1, 128, 32>}, {transform_indices = @transform_3, window_bounds = array<i64: 1, 8, 128>}, {transform_indices = @transform_4, window_bounds = array<i64: 1, 8, 32>}, {transform_indices = @transform_5, window_bounds = array<i64: 1, 8, 128>}]} {
    %c0 = arith.constant 0 : index
    %c0_0 = arith.constant 0 : index
    %c0_1 = arith.constant 0 : index
    %0 = vector.load %arg2[%c0, %c0_0, %c0_1] : memref<1x8x32xf32, #tpu.memory_space<vmem>>, vector<1x8x32xf32>
    %1 = vector.shape_cast %0 : vector<1x8x32xf32> to vector<8x32xf32>
    %cst = arith.constant 0.176776692 : f32
    %2 = vector.broadcast %cst : f32 to vector<8x32xf32>
    %3 = arith.mulf %1, %2 : vector<8x32xf32>
    %c0_2 = arith.constant 0 : index
    %c0_3 = arith.constant 0 : index
    %c0_4 = arith.constant 0 : index
    %4 = vector.load %arg3[%c0_2, %c0_3, %c0_4] : memref<1x128x32xf32, #tpu.memory_space<vmem>>, vector<1x128x32xf32>
    %5 = vector.shape_cast %4 : vector<1x128x32xf32> to vector<128x32xf32>
    %cst_5 = arith.constant dense<0.000000e+00> : vector<8x128xf32>
    %6 = tpu.matmul %3, %5, %cst_5 {dimension_numbers = #tpu.dot_dimension_numbers<[1], [1], [0], [0], [0, 0, 1, 0], [], []>} : vector<8x32xf32>, vector<128x32xf32>, vector<8x128xf32> -> vector<8x128xf32>
    %c0_6 = arith.constant 0 : index
    %c0_7 = arith.constant 0 : index
    %c0_8 = arith.constant 0 : index
    %7 = vector.load %arg5[%c0_6, %c0_7, %c0_8] : memref<1x8x128xi8, #tpu.memory_space<vmem>>, vector<1x8x128xi8>
    %8 = vector.shape_cast %7 : vector<1x8x128xi8> to vector<8x128xi8>
    %c0_i8 = arith.constant 0 : i8
    %9 = vector.broadcast %c0_i8 : i8 to vector<8x128xi8>
    %10 = arith.cmpi ne, %8, %9 : vector<8x128xi8>
    %cst_9 = arith.constant -1.000000e+30 : f32
    %11 = vector.broadcast %cst_9 : f32 to vector<8x128xf32>
    %12 = arith.select %10, %11, %6 : vector<8x128xi1>, vector<8x128xf32>
    %13 = tpu.iota {dimensions = array<i32: 1>} : vector<8x128xi32>
    %c0_i32 = arith.constant 0 : i32
    %14 = vector.broadcast %c0_i32 : i32 to vector<8x128xi32>
    %15 = arith.addi %14, %13 : vector<8x128xi32>
    %c8_i32 = arith.constant 8 : i32
    %16 = vector.broadcast %c8_i32 : i32 to vector<8x128xi32>
    %17 = arith.cmpi sge, %15, %16 : vector<8x128xi32>
    %cst_10 = arith.constant 0xFF800000 : f32
    %18 = vector.broadcast %cst_10 : f32 to vector<8x128xf32>
    %19 = arith.select %17, %18, %12 : vector<8x128xi1>, vector<8x128xf32>
    %cst_11 = arith.constant dense<0xFF800000> : vector<8xf32>
    %20 = vector.multi_reduction <maximumf>, %19, %cst_11 [1] : vector<8x128xf32> to vector<8xf32>
    %21 = vector.shape_cast %20 : vector<8xf32> to vector<8x1xf32>
    %22 = vector.broadcast %21 : vector<8x1xf32> to vector<8x128xf32>
    %23 = arith.subf %19, %22 : vector<8x128xf32>
    %24 = math.exp %23 : vector<8x128xf32>
    %cst_12 = arith.constant dense<0.000000e+00> : vector<8xf32>
    %25 = vector.multi_reduction <add>, %24, %cst_12 [1] : vector<8x128xf32> to vector<8xf32>
    %26 = vector.shape_cast %25 : vector<8xf32> to vector<8x1xf32>
    %27 = tpu.reciprocal %26 {approx = true} : vector<8x1xf32> -> vector<8x1xf32>
    %28 = vector.broadcast %27 : vector<8x1xf32> to vector<8x128xf32>
    %29 = arith.mulf %24, %28 : vector<8x128xf32>
    %c0_13 = arith.constant 0 : index
    %c0_14 = arith.constant 0 : index
    %c0_15 = arith.constant 0 : index
    %30 = vector.load %arg7[%c0_13, %c0_14, %c0_15] : memref<1x8x128xf32, #tpu.memory_space<vmem>>, vector<1x8x128xf32>
    %31 = vector.shape_cast %30 : vector<1x8x128xf32> to vector<8x128xf32>
    %32 = vector.shape_cast %29 : vector<8x128xf32> to vector<1x8x128xf32>
    tpu.vector_store %arg7[%c0_13, %c0_14, %c0_15], %32 {strides = array<i32>} : memref<1x8x128xf32, #tpu.memory_space<vmem>>, vector<1x8x128xf32>,
    %c0_16 = arith.constant 0 : index
    %c0_17 = arith.constant 0 : index
    %c0_18 = arith.constant 0 : index
    %33 = vector.load %arg4[%c0_16, %c0_17, %c0_18] : memref<1x128x32xf32, #tpu.memory_space<vmem>>, vector<1x128x32xf32>
    %34 = vector.shape_cast %33 : vector<1x128x32xf32> to vector<128x32xf32>
    %cst_19 = arith.constant dense<0.000000e+00> : vector<8x32xf32>
    %35 = tpu.matmul %29, %34, %cst_19 {dimension_numbers = #tpu.dot_dimension_numbers<[1], [0], [0], [1], [0, 0, 1, 1], [], []>} : vector<8x128xf32>, vector<128x32xf32>, vector<8x32xf32> -> vector<8x32xf32>
    %c0_20 = arith.constant 0 : index
    %c0_21 = arith.constant 0 : index
    %c0_22 = arith.constant 0 : index
    %36 = vector.load %arg6[%c0_20, %c0_21, %c0_22] : memref<1x8x32xf32, #tpu.memory_space<vmem>>, vector<1x8x32xf32>
    %37 = vector.shape_cast %36 : vector<1x8x32xf32> to vector<8x32xf32>
    %38 = vector.shape_cast %35 : vector<8x32xf32> to vector<1x8x32xf32>
    tpu.vector_store %arg6[%c0_20, %c0_21, %c0_22], %38 {strides = array<i32>} : memref<1x8x32xf32, #tpu.memory_space<vmem>>, vector<1x8x32xf32>,
    return
  }
  func.func @transform_0(%arg0: i32, %arg1: i32) -> (i32, i32, i32) {
    %c0_i32 = arith.constant 0 : i32
    %c0_i32_0 = arith.constant 0 : i32
    return %arg0, %arg1, %c0_i32 : i32, i32, i32
  }
  func.func @transform_1(%arg0: i32, %arg1: i32) -> (i32, i32, i32) {
    %c0_i32 = arith.constant 0 : i32
    %c0_i32_0 = arith.constant 0 : i32
    %c0_i32_1 = arith.constant 0 : i32
    return %arg0, %c0_i32, %c0_i32_0 : i32, i32, i32
  }
  func.func @transform_2(%arg0: i32, %arg1: i32) -> (i32, i32, i32) {
    %c0_i32 = arith.constant 0 : i32
    %c0_i32_0 = arith.constant 0 : i32
    %c0_i32_1 = arith.constant 0 : i32
    return %arg0, %c0_i32, %c0_i32_0 : i32, i32, i32
  }
  func.func @transform_3(%arg0: i32, %arg1: i32) -> (i32, i32, i32) {
    %c0_i32 = arith.constant 0 : i32
    %c0_i32_0 = arith.constant 0 : i32
    return %arg0, %arg1, %c0_i32 : i32, i32, i32
  }
  func.func @transform_4(%arg0: i32, %arg1: i32) -> (i32, i32, i32) {
    %c0_i32 = arith.constant 0 : i32
    %c0_i32_0 = arith.constant 0 : i32
    return %arg0, %arg1, %c0_i32 : i32, i32, i32
  }
  func.func @transform_5(%arg0: i32, %arg1: i32) -> (i32, i32, i32) {
    %c0_i32 = arith.constant 0 : i32
    %c0_i32_0 = arith.constant 0 : i32
    return %arg0, %arg1, %c0_i32 : i32, i32, i32
  }
}

</mosaic_0001>

<bundles_post_ra>
// kernel: tpu_custom_call.1
= control target key start
LH: loop header
LB: loop body
LE: loop exit
PB: predicated region body
PF: predicated region fallthrough
CT: control target
= control target key end

     0   :  { %11 = vsyncpa [#allocation3], 0  ;;  %s1407_s0 = inlined_call_operand.vmem [shape: f32[2,8,32], index: 0, kind: input, shape index: {}]   ;;  %s1408_s1 = inlined_call_operand.vmem [shape: f32[2,128,32], index: 1, kind: input, shape index: {}]   ;;  %s1409_s2 = inlined_call_operand.vmem [shape: f32[2,128,32], index: 2, kind: input, shape index: {}]   ;;  %s1410_s3 = inlined_call_operand.vmem [shape: s8[2,8,128], index: 3, kind: input, shape index: {}]   ;;  %s1411_s4 = inlined_call_operand.hbm [shape: f32[2,8,32], index: 4, kind: output, shape index: {0}]   ;;  %s1412_s5 = inlined_call_operand.hbm [shape: f32[2,8,128], index: 5, kind: output, shape index: {1}]  }
   0x1   :  { %13 = vsyncpa [#allocation3 + $0x1], 0 }
   0x2   :  { %14 = vsyncpa [#allocation5], 0 }
   0x3   :  { %16 = vsyncpa [#allocation5 + $0x1], 0  ;;  %s1166_s18 = smov 0   ;;  %s1168_s19 = smov 0  }
   0x4   :  { %s1170_s20 = smov 0   ;;  %s1172_s21 = smov 0  }
   0x5   :  { %s1174_s22 = smov 0   ;;  %s1176_s23 = smov 0  }
   0x6 LB: > { %s752_s24 = sadd.s32 4294967295, %s1128_s23   ;;  %s753_s25 = sadd.s32 4294967294, %s1128_s23   ;;  %s1128_s23 = sphi %s1176_s23, %s22_s23   ;;  %s1124_s22 = sphi %s1174_s22, %s1421_s22   ;;  %s1120_s21 = sphi %s1172_s21, %s1420_s21   ;;  %s1116_s20 = sphi %s1170_s20, %s1419_s20   ;;  %s1112_s19 = sphi %s1168_s19, %s1418_s19   ;;  %s1108_s18 = sphi %s1166_s18, %s1417_s18  }
   0x7   : > { %s34_s26 = sadd.s32 1, %s1124_s22  ;;  %s151_s27 = sadd.s32 1, %s1116_s20 }
   0x8   : > { %p36_p0 = scmp.ge.s32.totalorder %s34_s26, 2  ;;  %p161_p1 = scmp.ne.s32.totalorder %s1116_s20, %s1112_s19 }
   0x9   : > { %p162_p2 = scmp.eq.s32.totalorder %s752_s24, 1  ;;  %p167_p3 = scmp.ne.s32.totalorder %s1112_s19, %s1108_s18 }
   0xa   : > { %s1423_s26 = smov (%p36_p0, %s34_s26), 0  ;;  %p168_p5 = scmp.eq.s32.totalorder %s753_s25, 1 }
   0xb   : > { %p1206_p4 = por %p162_p2, %p161_p1  ;;  %s146_s29 = ssub.s32 %s1124_s22, %s1423_s26 }
   0xc   : > { %p756_p6 = scmp.ge.s32.totalorder %s1128_s23, 1  ;;  %p149_p7 = scmp.eq.s32.totalorder %s146_s29, 0 }
   0xd   : > { %p1213_p8 = por %p168_p5, %p167_p3  ;;  %p250_p9 = scmp.lt.s32.totalorder %s1128_s23, 3 }
   0xe   : > { %s1219_s6 = scalar_select %p149_p7, %s1116_s20, %s151_s27  }
   0xf   : > { %p251_p10 = pnand %p756_p6, %p250_p9 }
  0x10   : > { %p302_p11 = scmp.lt.s32.totalorder (!%p251_p10), %s1120_s21, 1  ;;  %v1130_v0 = vmov (!%p251_p10), 0.0|0.0   ;;  %vm1131_vm0 = vmmov (!%p251_p10), 0   ;;  %v1132_v1 = vmov (!%p251_p10), 0.0   ;;  %vm346_vm1 = vcmask (!%p251_p10), 261120   ;;  %s1134_s24 = smov (!%p251_p10), [#allocation4]  }
  0x11   : > { %254 = sbr.rel (%p251_p10) target bundleno = 846 (0x34e), region = 36  ;;  %894 = vmatprep.subr.bf16.mxu0 (!%p251_p10), %v1130_v0  ;;  %856 = vmatprep.mubr.msk.f32.mxu0 (!%p251_p10), %vm1131_vm0, %v1132_v1  ;;  %vm1239_vm2 = vmpackc.low (!%p251_p10), %vm346_vm1, %vm346_vm1  ;;  %v1133_v30 = vmov (!%p251_p10), 0   ;;  %v474_v32 = vlaneseq (!%p251_p10) }
  0x12   : > { %926 = vmatprep.subr.bf16.mxu1 (!%p251_p10), %v1130_v0  ;;  %891 = vmatprep.mubr.msk.f32.mxu1 (!%p251_p10), %vm1131_vm0, %v1132_v1 }
  0x13   : > { %v475_v34 = vand.u32 (!%p251_p10), 127, %v474_v32 }
  0x15   : > { %vm476_vm5 = vcmp.ge.s32.totalorder (!%p251_p10), %v475_v34, 8 }
  0x18   : > { %s1224_s7 = scalar_select %p302_p11, %s1120_s21, 1 }
  0x1a   : > { %s788_s8 = sshll.u32 %s1224_s7, 7  ;;  %s759_s12 = sshll.u32 %s1224_s7, 3 }
  0x1b   : > { %s1233_s11 = scalar_lea.vmem %s1408_s1, %s788_s8  ;;  %s308_s15 = scalar_lea.vmem %s1407_s0, %s759_s12 }
  0x1c   : > { %v330_v2 = vld [vmem:[%s1233_s11] sm:$0xff]  ;;  %v331_v3 = vld [vmem:[%s1233_s11 + $0x8] sm:$0xff]  ;;  %v332_v6 = vld [vmem:[%s1233_s11 + $0x10] sm:$0xff]  ;;  %s764_s16 = sshll.u32 %s1224_s7, 1  ;;  %s1294_s9 = scalar_lea.vmem %s1409_s2, %s788_s8 }
  0x1d   : > { %v895_v5 = vpack.c.bf16 %v331_v3, %v330_v2  ;;  %v333_v7 = vld [vmem:[%s1233_s11 + $0x18] sm:$0xff]  ;;  %v334_v9 = vld [vmem:[%s1233_s11 + $0x20] sm:$0xff]  ;;  %v335_v10 = vld [vmem:[%s1233_s11 + $0x28] sm:$0xff]  ;;  %s325_s25 = scalar_lea.vmem %s1410_s3, %s764_s16  ;;  %s1320_s7 = sand.u32 1, %s1112_s19  }
  0x1e   : > { %v899_v8 = vpack.c.bf16 %v333_v7, %v332_v6  ;;  %v903_v11 = vpack.c.bf16 %v335_v10, %v334_v9  ;;  %v336_v12 = vld [vmem:[%s1233_s11 + $0x30] sm:$0xff]  ;;  %v337_v13 = vld [vmem:[%s1233_s11 + $0x38] sm:$0xff]  ;;  %v338_v15 = vld [vmem:[%s1233_s11 + $0x40] sm:$0xff]  ;;  %s757_s8 = sshll.u32 %s1320_s7, 3  ;;  %s581_s16 = scalar_lea.sflag [#allocation5], %s1320_s7 }
  0x1f   : > { %897 = vmatpush3.bf16.xpose.msk.msra.mxu0 %vm1239_vm2, %v895_v5  ;;  %v907_v14 = vpack.c.bf16 %v337_v13, %v336_v12  ;;  %v339_v16 = vld [vmem:[%s1233_s11 + $0x48] sm:$0xff]  ;;  %v340_v18 = vld [vmem:[%s1233_s11 + $0x50] sm:$0xff]  ;;  %v341_v19 = vld [vmem:[%s1233_s11 + $0x58] sm:$0xff]  ;;  %s301_s10 = scalar_lea.vmem [#allocation4], %s757_s8 }
  0x20   : > { %898 = vmatprep.subr.bf16.mxu0 %v1130_v0  ;;  %v911_v17 = vpack.c.bf16 %v339_v16, %v338_v15  ;;  %v915_v20 = vpack.c.bf16 %v341_v19, %v340_v18  ;;  %v342_v21 = vld [vmem:[%s1233_s11 + $0x60] sm:$0xff]  ;;  %v343_v22 = vld [vmem:[%s1233_s11 + $0x68] sm:$0xff]  ;;  %v344_v24 = vld [vmem:[%s1233_s11 + $0x70] sm:$0xff] }
  0x21   : > { %v919_v23 = vpack.c.bf16 %v343_v22, %v342_v21  ;;  %v345_v25 = vld [vmem:[%s1233_s11 + $0x78] sm:$0xff]  ;;  %v328_v27 = vld [vmem:[%s308_s15] sm:$0xff]  ;;  %v489_v40 = vld [vmem:[%s1294_s9 + $0x8] sm:$0xff]  ;;  %s784_s11 = sshll.u32 %s1120_s21, 7  ;;  %s609_s15 = sshll.u32 %s301_s10, 4  ;;  %s610_s15 = int_to_ptr.vmem [resolvable:$true] %s609_s15 }
  0x22   : > { %v923_v26 = vpack.c.bf16 %v345_v25, %v344_v24  ;;  %v329_v28 = vmul.f32 0.17677669, %v328_v27  ;;  %v468_v29 = vld [vmem:[%s325_s25] sm:$0x3]  ;;  %v490_v41 = vld [vmem:[%s1294_s9 + $0x10] sm:$0xff]  ;;  %v491_v43 = vld [vmem:[%s1294_s9 + $0x18] sm:$0xff]  ;;  %s1331_s14 = scalar_lea.hbm %s1412_s5, %s784_s11 }
  0x23   : > { %vm469_vm3 = vnez %v468_v29  ;;  %v488_v39 = vld [vmem:[%s1294_s9] sm:$0xff]  ;;  %v930_v44 = vpack.c.bf16 %v491_v43, %v490_v41  ;;  %v493_v46 = vld [vmem:[%s1294_s9 + $0x28] sm:$0xff]  ;;  %v494_v48 = vld [vmem:[%s1294_s9 + $0x30] sm:$0xff]  ;;  %s1018_s17 = scalar_lea.vmem %s610_s15, 128  ;;  %s1022_s25 = sshll.u32 %s1134_s24, 4  ;;  %s1023_s25 = int_to_ptr.vmem [resolvable:$false] %s1022_s25 }
  0x24   : > { %v470_v31 = vsel %vm469_vm3, 16843009, %v1133_v30  ;;  %v927_v42 = vpack.c.bf16 %v489_v40, %v488_v39  ;;  %v492_v45 = vld [vmem:[%s1294_s9 + $0x20] sm:$0xff]  ;;  %v495_v49 = vld [vmem:[%s1294_s9 + $0x38] sm:$0xff]  ;;  %v497_v52 = vld [vmem:[%s1294_s9 + $0x48] sm:$0xff]  ;;  %p1019_p12 = scmp.ne.s32.totalorder %s610_s15, %s1018_s17  ;;  %s1024_s27 = scalar_lea.vmem %s1023_s25, 256 }
  0x25   : > { %v471_v33 = vunpack.c.0.s8 %v470_v31  ;;  %v933_v47 = vpack.c.bf16 %v493_v46, %v492_v45  ;;  %v936_v50 = vpack.c.bf16 %v495_v49, %v494_v48  ;;  %v496_v51 = vld [vmem:[%s1294_s9 + $0x40] sm:$0xff]  ;;  %v498_v58 = vld [vmem:[%s1294_s9 + $0x50] sm:$0xff]  ;;  %v499_v59 = vld [vmem:[%s1294_s9 + $0x58] sm:$0xff]  ;;  %p1025_p1 = scmp.lt.s32.totalorder %s610_s15, %s1023_s25  ;;  %p1026_p2 = scmp.lt.s32.totalorder %s1024_s27, %s1018_s17 }
  0x26   : > { %928 = vmatpush3.bf16.msra.mxu1 %v927_v42  ;;  %v939_v53 = vpack.c.bf16 %v497_v52, %v496_v51  ;;  %v942_v60 = vpack.c.bf16 %v499_v59, %v498_v58  ;;  %v500_v61 = vld [vmem:[%s1294_s9 + $0x60] sm:$0xff]  ;;  %v501_v62 = vld [vmem:[%s1294_s9 + $0x68] sm:$0xff]  ;;  %v502_v1 = vld [vmem:[%s1294_s9 + $0x70] sm:$0xff]  ;;  %p1020_p13 = pnand %p1019_p12, %p1206_p4 }
  0x27   : > { %901 = vmatpush3.bf16.xpose.msk.msra.mxu0 %vm1239_vm2, %v899_v8  ;;  %vm472_vm4 = vcmp.ne.s32.totalorder %v471_v33, 0  ;;  %929 = vmatprep.subr.bf16.mxu1 %v1130_v0  ;;  %v945_v63 = vpack.c.bf16 %v501_v62, %v500_v61  ;;  %v503_v2 = vld [vmem:[%s1294_s9 + $0x78] sm:$0xff]  ;;  %p1027_p3 = por %p1026_p2, %p1025_p1 }
  0x28   : > { %902 = vmatprep.subr.bf16.mxu0 %v1130_v0  ;;  %v948_v3 = vpack.c.bf16 %v503_v2, %v502_v1  ;;  %p1021_p0 = pneg %p1020_p13 }
  0x2a   : > { %931 = vmatpush3.bf16.msra.mxu1 %v930_v44  ;;  %p1028_p5 = pnand %p1027_p3, %p1021_p0 }
  0x2b   : > { %932 = vmatprep.subr.bf16.mxu1 %v1130_v0 }
  0x2e   : > { %934 = vmatpush3.bf16.msra.mxu1 %v933_v47 }
  0x2f   : > { %905 = vmatpush3.bf16.xpose.msk.msra.mxu0 %vm1239_vm2, %v903_v11  ;;  %935 = vmatprep.subr.bf16.mxu1 %v1130_v0 }
  0x30   : > { %906 = vmatprep.subr.bf16.mxu0 %v1130_v0 }
  0x32   : > { %937 = vmatpush3.bf16.msra.mxu1 %v936_v50 }
  0x33   : > { %938 = vmatprep.subr.bf16.mxu1 %v1130_v0 }
  0x36   : > { %940 = vmatpush3.bf16.msra.mxu1 %v939_v53 }
  0x37   : > { %909 = vmatpush3.bf16.xpose.msk.msra.mxu0 %vm1239_vm2, %v907_v14  ;;  %941 = vmatprep.subr.bf16.mxu1 %v1130_v0 }
  0x38   : > { %910 = vmatprep.subr.bf16.mxu0 %v1130_v0 }
  0x3a   : > { %943 = vmatpush3.bf16.msra.mxu1 %v942_v60 }
  0x3b   : > { %944 = vmatprep.subr.bf16.mxu1 %v1130_v0 }
  0x3e   : > { %946 = vmatpush3.bf16.msra.mxu1 %v945_v63 }
  0x3f   : > { %913 = vmatpush3.bf16.xpose.msk.msra.mxu0 %vm1239_vm2, %v911_v17  ;;  %947 = vmatprep.subr.bf16.mxu1 %v1130_v0 }
  0x40   : > { %914 = vmatprep.subr.bf16.mxu0 %v1130_v0 }
  0x42   : > { %949 = vmatpush3.bf16.msra.mxu1 %v948_v3 }
  0x47   : > { %917 = vmatpush3.bf16.xpose.msk.msra.mxu0 %vm1239_vm2, %v915_v20 }
  0x48   : > { %918 = vmatprep.subr.bf16.mxu0 %v1130_v0 }
  0x4f   : > { %921 = vmatpush3.bf16.xpose.msk.msra.mxu0 %vm1239_vm2, %v919_v23 }
  0x50   : > { %922 = vmatprep.subr.bf16.mxu0 %v1130_v0 }
  0x57   : > { %925 = vmatpush3.bf16.xpose.msk.msra.mxu0 %vm1239_vm2, %v923_v26 }
  0x5e   : > { %857 = vmatmul.mubr.msk.f32.vlgmr.msra.gmra.mrb[0].mxu0 %vm346_vm1, %v329_v28 }
 0x131   : > { %v464_v35 = vpop.f32.mrb[0].mxu0 }
 0x132   : > { %v473_v36 = vsel %vm472_vm4, -1e+30, %v464_v35  ;;  %v858_v37 = vpop.f32.mrb[1].mxu0 }
 0x133   : > { %v477_v38 = vsel %vm476_vm5, -inf, %v473_v36 }
 0x134   : > { %478 = vmax.xlane.f32.xlu0 %v477_v38 }
 0x1c1   : > { %v479_v54 = vpop.xlane.xlu0 %478 }
 0x1c2   : > { %v480_v55 = vsub.f32 %v477_v38, %v479_v54 }
 0x1c4   : > { %v481_v56 = vmul.f32 1.442695, %v480_v55 }
 0x1c6   : > { %1014 = vpow2.f32 %v481_v56 }
 0x1d0   : > { %v1015_v57 = vpop.eup %1014 }
 0x1d1   : > { %483 = vadd.xlane.f32.xlu0 %v1015_v57 }
 0x25e   : > { %v484_v4 = vpop.xlane.xlu0 %483 }
 0x25f   : > { %1016 = vrcp.f32 %v484_v4 }
 0x269   : > { %v1017_v5 = vpop.eup %1016 }
 0x26a   : > { %v486_v6 = vmul.f32 %v1017_v5, %v1015_v57 }
 0x26c   : > { %892 = vmatmul.mubr.f32.vlgmr.msra.gmra.mrb[0].mxu1 %v486_v6  ;;  %487 = vst [vmem:[%s301_s10] sm:$0xff] %v486_v6 }
 0x26d   : > { %1031 = shalt.err (!%p1028_p5)
}
 0x26e   : > { %s1032_s29 = scalar_lea.hbm %s1331_s14, 128  ;;  %s1036_s12 = scalar_lea.hbm %s1412_s5, 256 }
 0x26f   : > { %p1033_p6 = scmp.ne.s32.totalorder %s1331_s14, %s1032_s29  ;;  %p1037_p10 = scmp.lt.u32.totalorder %s1331_s14, %s1412_s5 }
 0x270   : > { %p1038_p11 = scmp.lt.u32.totalorder %s1036_s12, %s1032_s29  ;;  %p1040_p13 = scmp.lt.u32.totalorder %s1032_s29, %s1331_s14 }
 0x271   : > { %p1034_p7 = pnand %p1033_p6, %p1206_p4 }
 0x272   : > { %p1039_p12 = por %p1038_p11, %p1037_p10 }
 0x273   : > { %p1035_p9 = pneg %p1034_p7 }
 0x274   : > { %p1041_p0 = por %p1040_p13, %p1039_p12 }
 0x276   : > { %p1042_p1 = pnand %p1041_p0, %p1035_p9 }
 0x278   : > { %1045 = shalt.err (!%p1042_p1)
}
 0x279   : > { %951 = dma.vmem_to_hbm [thread:$0]  (%p1206_p4), %s610_s15, 128, %s1331_s14, %s581_s16  }
 0x27a   : > { %s294_s17 = scalar_lea.vmem [#allocation2], %s757_s8  ;;  %s1358_s10 = scalar_lea.hbm %s1411_s4, %s784_s11 }
 0x27b   : > { %s595_s25 = sshll.u32 %s294_s17, 4  ;;  %s576_s29 = scalar_lea.sflag [#allocation3], %s1320_s7  ;;  %s1360_s25 = int_to_ptr.vmem [resolvable:$true] %s595_s25 }
 0x27c   : > { %s1046_s14 = scalar_lea.vmem %s1360_s25, 128  ;;  %s1135_s21 = smov [#allocation2]  }
 0x27d   : > { %p1047_p2 = scmp.ne.s32.totalorder %s1360_s25, %s1046_s14  ;;  %s1050_s8 = sshll.u32 %s1135_s21, 4  ;;  %s1051_s8 = int_to_ptr.vmem [resolvable:$false] %s1050_s8 }
 0x27e   : > { %s1052_s11 = scalar_lea.vmem %s1051_s8, 256  ;;  %p1053_p6 = scmp.lt.s32.totalorder %s1360_s25, %s1051_s8 }
 0x27f   : > { %p1048_p3 = pnand %p1047_p2, %p1206_p4  ;;  %p1054_p7 = scmp.lt.s32.totalorder %s1052_s11, %s1046_s14 }
 0x281   : > { %p1049_p5 = pneg %p1048_p3  ;;  %p1055_p9 = por %p1054_p7, %p1053_p6 }
 0x283   : > { %p1056_p10 = pnand %p1055_p9, %p1049_p5 }
 0x33f   : > { %v570_v0 = vpop.f32.mrb[0].mxu1 }
 0x340   : > { %574 = vst.msk [vmem:[%s294_s17] sm:$0xff] %vm346_vm1, %v570_v0  ;;  %v893_v7 = vpop.f32.mrb[1].mxu1 }
 0x341   : > { %1059 = shalt.err (!%p1056_p10)
}
 0x342   : > { %s1060_s7 = scalar_lea.hbm %s1358_s10, 128  ;;  %s1064_s12 = scalar_lea.hbm %s1411_s4, 256 }
 0x343   : > { %p1061_p11 = scmp.ne.s32.totalorder %s1358_s10, %s1060_s7  ;;  %p1065_p0 = scmp.lt.u32.totalorder %s1358_s10, %s1411_s4 }
 0x344   : > { %p1066_p1 = scmp.lt.u32.totalorder %s1064_s12, %s1060_s7  ;;  %p1068_p3 = scmp.lt.u32.totalorder %s1060_s7, %s1358_s10 }
 0x345   : > { %p1062_p12 = pnand %p1061_p11, %p1206_p4 }
 0x346   : > { %p1067_p2 = por %p1066_p1, %p1065_p0 }
 0x347   : > { %p1063_p13 = pneg %p1062_p12 }
 0x348   : > { %p1069_p5 = por %p1068_p3, %p1067_p2 }
 0x34a   : > { %p1070_p6 = pnand %p1069_p5, %p1063_p13 }
 0x34c   : > { %1073 = shalt.err (!%p1070_p6)
}
 0x34d   : > { %950 = dma.vmem_to_hbm [thread:$0]  (%p1206_p4), %s1360_s25, 128, %s1358_s10, %s576_s29  }
 0x34e PF: > { %p961_p7 = scmp.ge.s32.totalorder %s1128_s23, 2  ;;  %s621_s17 = sand.u32 1, %s1108_s18  }
 0x34f   : > { %s622_s27 = scalar_lea.sflag [#allocation3], %s621_s17 }
 0x350   : > { %p955_p9 = pnand %p961_p7, %p1213_p8 }
 0x352   : > { %1099 = dma.done.wait (!%p955_p9), %s622_s27, 128  }
 0x353   : > { %1101 = vsyncadd (!%p955_p9), %s622_s27, 4294967168  ;;  %s631_s9 = scalar_lea.sflag [#allocation5], %s621_s17 }
 0x354   : > { %1103 = dma.done.wait (!%p955_p9), %s631_s9, 128  }
 0x355   : > { %1105 = vsyncadd (!%p955_p9), %s631_s9, 4294967168  ;;  %s22_s23 = sadd.s32 1, %s1128_s23   ;;  %s1417_s18 = smov %s1112_s19 }
 0x356   : > { %p19_p10 = scmp.ge.s32.totalorder %s22_s23, 4   ;;  %s1418_s19 = smov %s1116_s20 }
 0x357   : > { %s1419_s20 = smov %s1219_s6  ;;  %s1420_s21 = smov %s1124_s22 }
 0x358   : > { %s1421_s22 = smov %s1423_s26  ;;  %21 = sbr.rel (!%p19_p10) target bundleno = 6 (0x6), region = 97 }
 0x35f   :  { %636 = vsyncpa [#allocation3], 1 }
 0x360   :  { %638 = vsyncpa [#allocation3 + $0x1], 1 }
 0x361   :  { %639 = vsyncpa [#allocation5], 1 }
 0x362   :  { %641 = vsyncpa [#allocation5 + $0x1], 1 }

</bundles_post_ra>
